<compile_context>
chip_gen: v7x
topology: tpu7x:2x2x1
jax: 0.10.0
libtpu: 0.0.40
codegen_flags: <defaults>
</compile_context>

<pallas_src>
import jax
import jax.numpy as jnp
from jax.experimental import pallas as pl
from jax.experimental.pallas import tpu as pltpu


# ----------------------------- helpers --------------------------------------
def _round_up(x, m):
    return ((x + m - 1) // m) * m


def _vmem_limit_bytes():
    # Generation-aware scoped-VMEM cap: 128 MiB chips (v5e/v6e) -> 64 MiB,
    # 64 MiB chips (v7x) -> 48 MiB, unknown -> conservative 32 MiB.
    try:
        cap = getattr(pltpu.get_tpu_info(), "vmem_capacity_bytes", None)
        if cap is None:
            return 32 * 1024 * 1024
        if cap >= 96 * 1024 * 1024:
            return 64 * 1024 * 1024
        return 48 * 1024 * 1024
    except Exception:
        return 32 * 1024 * 1024


def _pick_tiles(M, N, K, tm, tn, tk):
    # Clamp tiles to the (aligned) problem size.
    tm = min(tm, _round_up(M, 8))
    tn = min(tn, _round_up(N, 128))
    tk = min(tk, _round_up(K, 128))

    def n_par(tm_, tn_):
        return pl.cdiv(M, tm_) * pl.cdiv(N, tn_)

    # v7x has 2 TensorCores: keep >= 2 parallel (i,j) grid points when possible.
    while n_par(tm, tn) < 2 and (tm > 8 or tn > 128):
        if tn > 128:
            tn = max(128, ((tn // 2) // 128) * 128)
        else:
            tm = max(8, ((tm // 2) // 8) * 8)
    return tm, tn, tk


# ----------------------- small / whole-array path ---------------------------
def _linear_add_small_kernel(x_ref, wt_ref, b_ref, other_ref, o_ref):
    # x:(B,IN) @ wt:(IN,OUT) -> canonical contraction, clean MXU feed.
    y = jnp.dot(x_ref[...], wt_ref[...], preferred_element_type=jnp.float32)
    o_ref[...] = (y + b_ref[...] + other_ref[...]).astype(o_ref.dtype)


# ------------------- tiled / k-accumulating path (large shapes) -------------
def _tiled_kernel_f32_out(x_ref, wt_ref, b_ref, other_ref, o_ref):
    # f32 output: accumulate straight into o_ref (no scratch, no finalize copy).
    @pl.when(pl.program_id(2) == 0)
    def _():
        # Fold bias + residual into the init; hidden under the K loop.
        o_ref[...] = other_ref[...].astype(jnp.float32) + b_ref[...].astype(jnp.float32)

    o_ref[...] += jnp.dot(x_ref[...], wt_ref[...], preferred_element_type=jnp.float32)


def _tiled_kernel_acc(x_ref, wt_ref, b_ref, other_ref, o_ref, acc_ref):
    k = pl.program_id(2)

    @pl.when(k == 0)
    def _():
        acc_ref[...] = other_ref[...].astype(jnp.float32) + b_ref[...].astype(jnp.float32)

    acc_ref[...] += jnp.dot(x_ref[...], wt_ref[...], preferred_element_type=jnp.float32)

    @pl.when(k == pl.num_programs(2) - 1)
    def _():
        o_ref[...] = acc_ref[...].astype(o_ref.dtype)


# ------------------------------- wrapper -------------------------------------
def linear_add(feature_map, weight, bias, other, *, tm=512, tn=1024, tk=512,
               compute_dtype=None):
    """out = feature_map @ weight.T + bias + other  (nn.Linear semantics)."""
    B, IN = feature_map.shape
    OUT = weight.shape[0]
    out_dtype = feature_map.dtype
    bias2d = bias.reshape(1, OUT)
    # Pre-transpose once in the wrapper (free under jit; weight is a static param).
    wt = weight.T  # (IN, OUT)

    approx_elems = B * IN + IN * OUT + 2 * B * OUT
    if approx_elems <= (1 << 20):
        # Whole arrays as single blocks (legal when block == full array even if not
        # (8,128)-aligned).  At B=2, OUT=16 this call is invocation-overhead-bound.
        # TODO(synk): if OUT stays <128 in production, batch several linears / fold B
        # into lanes so stores are lane-dense, or skip Pallas entirely for this shape.
        alias = {3: 0} if other.dtype == out_dtype else {}
        return pl.pallas_call(
            _linear_add_small_kernel,
            out_shape=jax.ShapeDtypeStruct((B, OUT), out_dtype),
            grid_spec=pltpu.PrefetchScalarGridSpec(
                num_scalar_prefetch=0,
                grid=(1,),
                in_specs=[
                    pl.BlockSpec((B, IN), lambda i: (0, 0)),
                    pl.BlockSpec((IN, OUT), lambda i: (0, 0)),
                    pl.BlockSpec((1, OUT), lambda i: (0, 0)),
                    pl.BlockSpec((B, OUT), lambda i: (0, 0)),
                ],
                out_specs=pl.BlockSpec((B, OUT), lambda i: (0, 0)),
            ),
            input_output_aliases=alias,
            compiler_params=pltpu.CompilerParams(
                dimension_semantics=("arbitrary",)),
        )(feature_map, wt, bias2d, other)

    # Production path: tiled, K-accumulating, megacore-shardable.
    tm, tn, tk = _pick_tiles(B, OUT, IN, tm, tn, tk)
    Mp, Np, Kp = _round_up(B, tm), _round_up(OUT, tn), _round_up(IN, tk)

    x_p = jnp.pad(feature_map, ((0, Mp - B), (0, Kp - IN)))
    wt_p = jnp.pad(wt, ((0, Kp - IN), (0, Np - OUT)))
    b_p = jnp.pad(bias2d, ((0, 0), (0, Np - OUT)))
    other_p = jnp.pad(other, ((0, Mp - B), (0, Np - OUT)))

    if compute_dtype is not None:
        # Optional bf16 MXU feed (keeps f32 accumulation); halves DMA bytes/VMEM.
        x_p = x_p.astype(compute_dtype)
        wt_p = wt_p.astype(compute_dtype)

    f32_out = (out_dtype == jnp.float32)
    kernel = _tiled_kernel_f32_out if f32_out else _tiled_kernel_acc
    scratch = [] if f32_out else [pltpu.VMEM((tm, tn), jnp.float32)]
    alias = {3: 0} if other_p.dtype == out_dtype else {}

    grid = (Mp // tm, Np // tn, Kp // tk)
    out_p = pl.pallas_call(
        kernel,
        out_shape=jax.ShapeDtypeStruct((Mp, Np), out_dtype),
        grid_spec=pltpu.PrefetchScalarGridSpec(
            num_scalar_prefetch=0,
            grid=grid,
            in_specs=[
                pl.BlockSpec((tm, tk), lambda i, j, k: (i, k)),   # x
                pl.BlockSpec((tk, tn), lambda i, j, k: (k, j)),   # W^T (IN, OUT)
                pl.BlockSpec((1, tn), lambda i, j, k: (0, j)),    # bias
                pl.BlockSpec((tm, tn), lambda i, j, k: (i, j)),   # other (residual)
            ],
            out_specs=pl.BlockSpec((tm, tn), lambda i, j, k: (i, j)),
            scratch_shapes=scratch,
        ),
        input_output_aliases=alias,
        compiler_params=pltpu.CompilerParams(
            dimension_semantics=("parallel", "parallel", "arbitrary"),
            vmem_limit_bytes=_vmem_limit_bytes(),
        ),
    )(x_p, wt_p, b_p, other_p)

    if (Mp, Np) != (B, OUT):
        out_p = out_p[:B, :OUT]
    return out_p


if __name__ == "__main__":
    key = jax.random.PRNGKey(0)
    k_x, k_other, k_w, k_b = jax.random.split(key, 4)

    # --- demo shape matching the PyTorch module: Linear(16, 16), batch 2 ---
    B, IN, OUT = 2, 16, 16
    feature_map = jax.random.normal(k_x, (B, IN), dtype=jnp.float32)
    other = jax.random.normal(k_other, (B, OUT), dtype=jnp.float32)

    bound = 1.0 / (IN ** 0.5)   # nn.Linear default init range
    weight = jax.random.uniform(k_w, (OUT, IN), minval=-bound, maxval=bound,
                                dtype=jnp.float32)
    bias = jax.random.uniform(k_b, (OUT,), minval=-bound, maxval=bound,
                              dtype=jnp.float32)

    # Pure-JAX reference (computed BEFORE the call; `other` may be donated).
    ref = feature_map @ weight.T + bias + other

    out = jax.jit(linear_add)(feature_map, weight, bias, other)
    jax.block_until_ready(out)
    assert jnp.allclose(out, ref, atol=1e-5, rtol=1e-5), "small-path mismatch"

    # --- smoke-test the tiled / padded production path at a modest size ---
    kb = jax.random.split(jax.random.PRNGKey(1), 4)
    Bb, INb, OUTb = 512, 768, 1024
    xb = jax.random.normal(kb[0], (Bb, INb), dtype=jnp.float32)
    ob = jax.random.normal(kb[1], (Bb, OUTb), dtype=jnp.float32)
    wb = jax.random.normal(kb[2], (OUTb, INb), dtype=jnp.float32) * 0.02
    bb = jax.random.normal(kb[3], (OUTb,), dtype=jnp.float32) * 0.02
    ref_b = jnp.dot(xb, wb.T, precision=jax.lax.Precision.HIGHEST) + bb + ob

    out_b = jax.jit(linear_add)(xb, wb, bb, ob)
    jax.block_until_ready(out_b)
    assert jnp.allclose(out_b, ref_b, atol=1e-2, rtol=1e-2), "tiled-path mismatch"

    print("KERNEL_OK")
</pallas_src>

<mosaic_0001>
module attributes {stable_mosaic.version = 11 : i64} {
  func.func @_linear_add_small_kernel(%arg0: i32, %arg1: memref<2x16xf32, #tpu.memory_space<vmem>>, %arg2: memref<16x16xf32, #tpu.memory_space<vmem>>, %arg3: memref<1x16xf32, #tpu.memory_space<vmem>>, %arg4: memref<2x16xf32, #tpu.memory_space<vmem>>, %arg5: memref<2x16xf32, #tpu.memory_space<vmem>>) attributes {dimension_semantics = [#tpu.dimension_semantics<arbitrary>], iteration_bounds = array<i64: 1>, scalar_prefetch = 0 : i64, scratch_operands = 0 : i64, tpu.core_type = #tpu.core_type<tc>, window_params = [{pipeline_mode = #tpu.pipeline_mode<synchronous>, transform_indices = @transform_0, window_bounds = array<i64: 2, 16>}, {pipeline_mode = #tpu.pipeline_mode<synchronous>, transform_indices = @transform_1, window_bounds = array<i64: 16, 16>}, {pipeline_mode = #tpu.pipeline_mode<synchronous>, transform_indices = @transform_2, window_bounds = array<i64: 1, 16>}, {pipeline_mode = #tpu.pipeline_mode<synchronous>, transform_indices = @transform_3, window_bounds = array<i64: 2, 16>}, {pipeline_mode = #tpu.pipeline_mode<synchronous>, transform_indices = @transform_4, window_bounds = array<i64: 2, 16>}]} {
    %c0 = arith.constant 0 : index
    %c0_0 = arith.constant 0 : index
    %0 = vector.load %arg1[%c0, %c0_0] : memref<2x16xf32, #tpu.memory_space<vmem>>, vector<2x16xf32>
    %c0_1 = arith.constant 0 : index
    %c0_2 = arith.constant 0 : index
    %1 = vector.load %arg2[%c0_1, %c0_2] : memref<16x16xf32, #tpu.memory_space<vmem>>, vector<16x16xf32>
    %cst = arith.constant dense<0.000000e+00> : vector<2x16xf32>
    %2 = tpu.matmul %0, %1, %cst {dimension_numbers = #tpu.dot_dimension_numbers<[1], [0], [0], [1], [0, 0, 1, 1], [], []>} : vector<2x16xf32>, vector<16x16xf32>, vector<2x16xf32> -> vector<2x16xf32>
    %c0_3 = arith.constant 0 : index
    %c0_4 = arith.constant 0 : index
    %3 = vector.load %arg3[%c0_3, %c0_4] : memref<1x16xf32, #tpu.memory_space<vmem>>, vector<1x16xf32>
    %4 = vector.broadcast %3 : vector<1x16xf32> to vector<2x16xf32>
    %5 = arith.addf %2, %4 : vector<2x16xf32>
    %c0_5 = arith.constant 0 : index
    %c0_6 = arith.constant 0 : index
    %6 = vector.load %arg4[%c0_5, %c0_6] : memref<2x16xf32, #tpu.memory_space<vmem>>, vector<2x16xf32>
    %7 = arith.addf %5, %6 : vector<2x16xf32>
    %c0_7 = arith.constant 0 : index
    %c0_8 = arith.constant 0 : index
    %8 = vector.load %arg5[%c0_7, %c0_8] : memref<2x16xf32, #tpu.memory_space<vmem>>, vector<2x16xf32>
    tpu.vector_store %arg5[%c0_7, %c0_8], %7 {strides = array<i32>} : memref<2x16xf32, #tpu.memory_space<vmem>>, vector<2x16xf32>,
    return
  }
  func.func @transform_0(%arg0: i32) -> (i32, i32) {
    %c0_i32 = arith.constant 0 : i32
    %c0_i32_0 = arith.constant 0 : i32
    %c0_i32_1 = arith.constant 0 : i32
    return %c0_i32, %c0_i32_0 : i32, i32
  }
  func.func @transform_1(%arg0: i32) -> (i32, i32) {
    %c0_i32 = arith.constant 0 : i32
    %c0_i32_0 = arith.constant 0 : i32
    %c0_i32_1 = arith.constant 0 : i32
    return %c0_i32, %c0_i32_0 : i32, i32
  }
  func.func @transform_2(%arg0: i32) -> (i32, i32) {
    %c0_i32 = arith.constant 0 : i32
    %c0_i32_0 = arith.constant 0 : i32
    %c0_i32_1 = arith.constant 0 : i32
    return %c0_i32, %c0_i32_0 : i32, i32
  }
  func.func @transform_3(%arg0: i32) -> (i32, i32) {
    %c0_i32 = arith.constant 0 : i32
    %c0_i32_0 = arith.constant 0 : i32
    %c0_i32_1 = arith.constant 0 : i32
    return %c0_i32, %c0_i32_0 : i32, i32
  }
  func.func @transform_4(%arg0: i32) -> (i32, i32) {
    %c0_i32 = arith.constant 0 : i32
    %c0_i32_0 = arith.constant 0 : i32
    %c0_i32_1 = arith.constant 0 : i32
    return %c0_i32, %c0_i32_0 : i32, i32
  }
}

</mosaic_0001>

<bundles_post_ra>
// kernel: linear_add.1
= control target key start
LH: loop header
LB: loop body
LE: loop exit
PB: predicated region body
PF: predicated region fallthrough
CT: control target
= control target key end

     0   :  { %9 = vsyncpa [#allocation3], 0  ;;  %s267_s0 = inlined_call_operand.vmem [shape: f32[2,16], index: 0, kind: input, shape index: {}]   ;;  %s268_s1 = inlined_call_operand.vmem [shape: f32[16,16], index: 1, kind: input, shape index: {}]   ;;  %s269_s2 = inlined_call_operand.vmem [shape: f32[1,16], index: 2, kind: input, shape index: {}]   ;;  %s270_s3 = inlined_call_operand.hbm [shape: f32[2,16], index: 3, kind: input, shape index: {}, may-alias: {3,4}]   ;;  %s271_s4 = inlined_call_operand.hbm [shape: f32[2,16], index: 4, kind: output, shape index: {}, may-alias: {3,4}]  }
   0x1   :  { %10 = vsyncpa [#allocation4], 0  ;;  %s201_s15 = smov [#allocation2]   ;;  %s153_s19 = scalar_lea.hbm %s270_s3, 32 }
   0x2   :  { %s23_s16 = sshll.u32 %s201_s15, 4  ;;  %p154_p0 = scmp.ne.s32.totalorder %s270_s3, %s153_s19  ;;  %s24_s16 = int_to_ptr.vmem [resolvable:$true] %s23_s16 }
   0x3   :  { %p157_p1 = scmp.lt.u32.totalorder %s153_s19, %s270_s3 }
   0x5   :  { %p159_p2 = pnand %p157_p1, %p154_p0 }
   0x7   :  { %162 = shalt.err (!%p159_p2)
}
   0x8   :  { %s163_s24 = scalar_lea.vmem %s24_s16, 32  ;;  %p168_p4 = scmp.lt.s32.totalorder %s24_s16, %s24_s16 }
   0x9   :  { %p164_p3 = scmp.ne.s32.totalorder %s24_s16, %s163_s24  ;;  %p169_p5 = scmp.lt.s32.totalorder %s163_s24, %s163_s24 }
   0xb   :  { %p170_p6 = por %p169_p5, %p168_p4 }
   0xd   :  { %p171_p7 = pnand %p170_p6, %p164_p3 }
   0xf   :  { %174 = shalt.err (!%p171_p7)
}
  0x10   :  { %26 = dma.hbm_to_vmem [thread:$0]  %s270_s3, 32, %s24_s16, [#allocation3]  }
  0x11   :  { %197 = dma.done.wait [#allocation3], 32  }
  0x12   :  { %198 = vsyncadd [#allocation3], 4294967264  ;;  %v202_v0 = vmov 0.0|0.0   ;;  %vm203_vm0 = vmmov 0   ;;  %v204_v1 = vmov 0.0   ;;  %v31_v2 = vld [vmem:[%s268_s1] sm:$0xff] }
  0x13   :  { %145 = vmatprep.subr.bf16.mxu0 %v202_v0  ;;  %142 = vmatprep.mubr.msk.f32.mxu0 %vm203_vm0, %v204_v1  ;;  %v32_v3 = vld [vmem:[%s268_s1 + $0x8] sm:$0xff]  ;;  %v30_v5 = vld [vmem:[%s267_s0] sm:$0x3]  ;;  %vm40_vm1 = vcmask 130048   ;;  %s205_s8 = smov [#allocation5]   ;;  %vm116_vm2 = vcmask 123904  }
  0x14   :  { %v146_v4 = vpack.c.bf16 %v32_v3, %v31_v2  ;;  %v133_v6 = vld [vmem:[%s269_s2] ss:$0 sm:$0xff]  ;;  %s124_s9 = sshll.u32 %s205_s8, 4  ;;  %s125_s9 = int_to_ptr.vmem [resolvable:$true] %s124_s9 }
  0x15   :  { %v114_v8 = vld [vmem:[#allocation2] sm:$0x3]  ;;  %s175_s1 = scalar_lea.vmem %s125_s9, 32  ;;  %p180_p9 = scmp.lt.s32.totalorder %s125_s9, %s125_s9 }
  0x16   :  { %147 = vmatpush3.bf16.msra.mxu0 %v146_v4  ;;  %p176_p8 = scmp.ne.s32.totalorder %s125_s9, %s175_s1  ;;  %p181_p10 = scmp.lt.s32.totalorder %s175_s1, %s175_s1 }
  0x18   :  { %p182_p11 = por %p181_p10, %p180_p9 }
  0x19   :  { %143 = vmatmul.mubr.msk.f32.vlgmr.msra.gmra.mrb[0].mxu0 %vm40_vm1, %v30_v5 }
  0x1a   :  { %p183_p12 = pnand %p182_p11, %p176_p8 }
  0xec   :  { %v110_v7 = vpop.f32.mrb[0].mxu0 }
  0xed   :  { %v111_v9 = vadd.f32 %v133_v6, %v110_v7  ;;  %v144_v10 = vpop.f32.mrb[1].mxu0 }
  0xef   :  { %v115_v11 = vadd.f32 %v114_v8, %v111_v9 }
  0xf1   :  { %117 = vst.msk [vmem:[#allocation5] sm:$0x3] %vm116_vm2, %v115_v11 }
  0xf2   :  { %186 = shalt.err (!%p183_p12)
}
  0xf3   :  { %s187_s2 = scalar_lea.hbm %s271_s4, 32 }
  0xf4   :  { %p188_p13 = scmp.ne.s32.totalorder %s271_s4, %s187_s2  ;;  %p191_p0 = scmp.lt.u32.totalorder %s187_s2, %s271_s4 }
  0xf6   :  { %p193_p1 = pnand %p191_p0, %p188_p13 }
  0xf8   :  { %196 = shalt.err (!%p193_p1)
}
  0xf9   :  { %127 = dma.vmem_to_hbm [thread:$0]  %s125_s9, 32, %s271_s4, [#allocation4]  }
  0xfa   :  { %199 = dma.done.wait [#allocation4], 32  }
  0xfb   :  { %200 = vsyncadd [#allocation4], 4294967264 }
  0xfc   :  { %131 = vsyncpa [#allocation3], 1 }
  0xfd   :  { %132 = vsyncpa [#allocation4], 1 }

</bundles_post_ra>
